<compile_context>
chip_gen: v5e
topology: v5e:2x2
jax: 0.10.0
libtpu: 0.0.40
codegen_flags: <defaults>
</compile_context>

<pallas_src>
import functools

import jax
import jax.numpy as jnp
from jax.experimental import pallas as pl
from jax.experimental.pallas import tpu as pltpu

_LANE = 128
_K_TILE = 2048                    # K-reduction tile when in_features is large


def _round_up(v, m):
    return ((v + m - 1) // m) * m


def _device_vmem_bytes():
    """Physical VMEM per TensorCore (v5e/v6e: 128 MiB, v7x: 64 MiB)."""
    try:
        return int(pltpu.get_tpu_info().vmem_capacity_bytes)
    except Exception:
        return 64 * 1024 * 1024   # conservative default (v7x-sized)


def _pick_batch_tile(batch, vmem_cap):
    """Batch tile: block == B for small B; otherwise >=2 tiles (multiple of 8)
    so the 'parallel' axis can pipeline and shard across v7x's 2 TensorCores."""
    tb_max = 512 if vmem_cap > (64 << 20) else 256   # smaller tiles on v7x (64 MiB VMEM)
    if batch < 64:
        return batch                                  # single tile; block == full dim
    tb = _round_up(pl.cdiv(batch, 2), 8)
    return min(tb, tb_max)


# --------------------------------------------------------------------------
# Kernels
# --------------------------------------------------------------------------
def _head_train_kernel(x_ref, wt_ref, b_ref, o_ref, *, apply_sigmoid):
    """logits = x @ W^T + b, grid = (batch tiles, K tiles).

    The f32 output block is resident across the K axis and used directly as the
    accumulator (no VMEM scratch). bf16 operands feed the MXU, f32 accumulate.
    """
    k = pl.program_id(1)

    @pl.when(k == 0)
    def _():
        o_ref[...] = jnp.zeros_like(o_ref)

    o_ref[...] += jnp.dot(x_ref[...], wt_ref[...],
                          preferred_element_type=jnp.float32)

    @pl.when(k == pl.num_programs(1) - 1)
    def _():
        logits = o_ref[...] + b_ref[...]
        if apply_sigmoid:
            logits = jax.nn.sigmoid(logits)
        o_ref[...] = logits


def _head_eval_kernel(x_ref, wt_ref, b_ref, o_ref, sw_ref, *,
                      apply_sigmoid, num_scales):
    """Eval path: grid = (batch tiles,). The (tiny) scale loop is fully
    unrolled in one basic block; per-scale weights are resident in VMEM.

    x_ref : (S, TB, F) bf16        wt_ref: (S, F, C_pad) bf16
    o_ref : (TB, C_pad) f32        sw_ref: (S, TB, C_pad) f32
    """
    scores = [jnp.dot(x_ref[s], wt_ref[s], preferred_element_type=jnp.float32)
              for s in range(num_scales)]

    acc = scores[0]
    m = scores[0]
    for s in range(1, num_scales):
        acc = acc + scores[s]
        m = jnp.maximum(m, scores[s])

    exps = [jnp.exp(sc - m) for sc in scores]
    denom = exps[0]
    for s in range(1, num_scales):
        denom = denom + exps[s]
    inv = 1.0 / denom          # exact divide: eval path is tiny, keep accuracy
    for s in range(num_scales):
        sw_ref[s] = (exps[s] * inv).astype(sw_ref.dtype)

    logits = acc + b_ref[...]
    if apply_sigmoid:
        logits = jax.nn.sigmoid(logits)
    o_ref[...] = logits.astype(o_ref.dtype)


# --------------------------------------------------------------------------
# One-time parameter preparation (hoisted out of the per-call path)
# --------------------------------------------------------------------------
def prepare_head_params(W, b, *, num_scales=None, feat_dim=None):
    """Transpose + lane-pad + bf16-cast the weights ONCE.

    Returns a dict consumed by head_forward. Doing this per forward call would
    move K*C_pad*4 bytes through HBM twice per call (comparable to the kernel's
    own traffic at small batch)."""
    C, K = W.shape
    # Lane-dense class dim; 256-wide padding when C > 128 (v6e/v7x MXU width).
    C_pad = _round_up(max(C, 1), _LANE) if C <= _LANE else _round_up(C, 2 * _LANE)

    tk = K if K <= _K_TILE else _K_TILE
    K_pad = _round_up(K, tk)

    wt = jnp.pad(jnp.transpose(W),
                 ((0, K_pad - K), (0, C_pad - C))).astype(jnp.bfloat16)
    b2 = jnp.pad(b.astype(jnp.float32), (0, C_pad - C)).reshape(1, C_pad)

    wt_scales = None
    if num_scales is not None and feat_dim is not None:
        assert num_scales * feat_dim == K
        wt_scales = wt[:K].reshape(num_scales, feat_dim, C_pad)

    return dict(wt=wt, b2=b2, wt_scales=wt_scales, C=C, C_pad=C_pad,
                in_features=K, K_pad=K_pad, tk=tk,
                num_scales=num_scales, feat_dim=feat_dim)


# --------------------------------------------------------------------------
# Wrapper (mirrors head.forward)
# --------------------------------------------------------------------------
def head_forward(x, params, *, sigmoid_func, dropout=0.0,
                 num_scales=None, feat_dim=None, is_training=True):
    """Mirrors head.forward(). Returns logits, or (logits, scale_weights) in
    eval mode when num_scales/feat_dim are given. `params` comes from
    prepare_head_params()."""
    # Dropout with p=0.0 is the identity.
    # TODO(synk): dropout p>0 in training mode would need pltpu.prng_* masking.
    assert dropout == 0.0

    B, K = x.shape
    assert K == params["in_features"]
    C, C_pad = params["C"], params["C_pad"]

    vmem_cap = _device_vmem_bytes()
    vmem_limit = min((vmem_cap * 3) // 4, 96 * 1024 * 1024)
    tb = _pick_batch_tile(B, vmem_cap)
    nb = pl.cdiv(B, tb)

    if is_training or num_scales is None or feat_dim is None:
        K_pad, tk = params["K_pad"], params["tk"]
        nk = K_pad // tk
        x_b = x.astype(jnp.bfloat16)
        if K_pad > K:   # only for very large in_features (K-tiling)
            x_b = jnp.pad(x_b, ((0, 0), (0, K_pad - K)))

        kern = functools.partial(_head_train_kernel, apply_sigmoid=sigmoid_func)
        out = pl.pallas_call(
            kern,
            out_shape=jax.ShapeDtypeStruct((B, C_pad), jnp.float32),
            grid=(nb, nk),
            in_specs=[
                pl.BlockSpec((tb, tk), lambda i, k: (i, k)),       # x tile
                pl.BlockSpec((tk, C_pad), lambda i, k: (k, 0)),    # W^T K-tile
                pl.BlockSpec((1, C_pad), lambda i, k: (0, 0)),     # bias resident
            ],
            out_specs=pl.BlockSpec((tb, C_pad), lambda i, k: (i, 0)),
            compiler_params=pltpu.CompilerParams(
                dimension_semantics=("parallel", "arbitrary"),
                vmem_limit_bytes=vmem_limit),
        )(x_b, params["wt"], params["b2"])
        return out[:, :C]

    S, F = num_scales, feat_dim
    assert S * F == K
    assert params["wt_scales"] is not None and params["num_scales"] == S

    # Per-scale activation slabs, feature dim lane-dense. The model only runs
    # this path at batch==1, so this small XLA transpose is negligible.
    x_s = jnp.transpose(x.reshape(B, S, F), (1, 0, 2)).astype(jnp.bfloat16)

    kern = functools.partial(_head_eval_kernel,
                             apply_sigmoid=sigmoid_func, num_scales=S)
    logits, sw = pl.pallas_call(
        kern,
        out_shape=(
            jax.ShapeDtypeStruct((B, C_pad), jnp.float32),
            jax.ShapeDtypeStruct((S, B, C_pad), jnp.float32),
        ),
        grid=(nb,),
        in_specs=[
            pl.BlockSpec((S, tb, F), lambda i: (0, i, 0)),        # per-tile x, all scales
            pl.BlockSpec((S, F, C_pad), lambda i: (0, 0, 0)),     # all scale weights resident
            pl.BlockSpec((1, C_pad), lambda i: (0, 0)),           # bias resident
        ],
        out_specs=(
            pl.BlockSpec((tb, C_pad), lambda i: (i, 0)),          # logits
            pl.BlockSpec((S, tb, C_pad), lambda i: (0, i, 0)),    # scale weights
        ),
        compiler_params=pltpu.CompilerParams(
            dimension_semantics=("parallel",),
            vmem_limit_bytes=vmem_limit),
    )(x_s, params["wt_scales"], params["b2"])

    logits = logits[:, :C]
    # (S, B, C) -> (B, C, S) == torch.stack(scale_weights, dim=-1).
    scale_weights = jnp.transpose(sw[:, :, :C], (1, 2, 0))
    return logits, scale_weights


# --------------------------------------------------------------------------
# Pure-JAX reference (operands rounded to bf16 to match the kernel's MXU path)
# --------------------------------------------------------------------------
def _reference(x, W, b, *, sigmoid_func, num_scales=None, feat_dim=None,
               is_training=True):
    xb = x.astype(jnp.bfloat16).astype(jnp.float32)
    Wb = W.astype(jnp.bfloat16).astype(jnp.float32)
    logits = xb @ Wb.T + b[None, :].astype(jnp.float32)
    if sigmoid_func:
        logits = jax.nn.sigmoid(logits)
    if is_training or num_scales is None or feat_dim is None:
        return logits
    parts = [xb[:, i * feat_dim:(i + 1) * feat_dim]
             @ Wb[:, i * feat_dim:(i + 1) * feat_dim].T
             for i in range(num_scales)]
    scores = jnp.stack(parts, axis=-1)                  # (B, C, S)
    return logits, jax.nn.softmax(scores, axis=-1)


if __name__ == "__main__":
    # Small shapes: B=2, num_scales=4, feat_dim=32 -> in_features=128, classes=8.
    B, num_scales, feat_dim, C = 2, 4, 32, 8
    in_features = num_scales * feat_dim
    sigmoid_func = True

    key = jax.random.PRNGKey(0)
    kx, kw, kb = jax.random.split(key, 3)
    x = jax.random.normal(kx, (B, in_features), dtype=jnp.float32)

    # Deterministic nn.Linear-style init: U(-1/sqrt(in), 1/sqrt(in)).
    bound = 1.0 / jnp.sqrt(jnp.float32(in_features))
    W = jax.random.uniform(kw, (C, in_features), jnp.float32, -bound, bound)
    bias = jax.random.uniform(kb, (C,), jnp.float32, -bound, bound)

    # One-time weight prep (hoisted out of the forward path).
    params = prepare_head_params(W, bias, num_scales=num_scales, feat_dim=feat_dim)
    jax.block_until_ready(params["wt"])

    # Training-mode path (just the classifier).
    y_train = head_forward(x, params, sigmoid_func=sigmoid_func, is_training=True)
    jax.block_until_ready(y_train)

    # Eval-mode path with per-scale softmax weights.
    y_eval, sw = head_forward(x, params, sigmoid_func=sigmoid_func,
                              num_scales=num_scales, feat_dim=feat_dim,
                              is_training=False)
    jax.block_until_ready((y_eval, sw))

    # Correctness checks against a pure-JAX reference (bf16-rounded operands).
    ref_train = _reference(x, W, bias, sigmoid_func=sigmoid_func, is_training=True)
    ref_eval, ref_sw = _reference(x, W, bias, sigmoid_func=sigmoid_func,
                                  num_scales=num_scales, feat_dim=feat_dim,
                                  is_training=False)
    assert y_train.shape == (B, C)
    assert y_eval.shape == (B, C)
    assert sw.shape == (B, C, num_scales)
    assert jnp.allclose(y_train, ref_train, atol=2e-3, rtol=2e-3)
    assert jnp.allclose(y_eval, ref_eval, atol=2e-3, rtol=2e-3)
    assert jnp.allclose(sw, ref_sw, atol=2e-3, rtol=2e-3)

    print("KERNEL_OK")
</pallas_src>

<mosaic_0001>
module attributes {stable_mosaic.version = 11 : i64} {
  func.func @_head_train_kernel(%arg0: i32, %arg1: i32, %arg2: memref<2x128xbf16, #tpu.memory_space<vmem>>, %arg3: memref<128x128xbf16, #tpu.memory_space<vmem>>, %arg4: memref<1x128xf32, #tpu.memory_space<vmem>>, %arg5: memref<2x128xf32, #tpu.memory_space<vmem>>) attributes {dimension_semantics = [#tpu.dimension_semantics<parallel>, #tpu.dimension_semantics<arbitrary>], iteration_bounds = array<i64: 1, 1>, scalar_prefetch = 0 : i64, scratch_operands = 0 : i64, tpu.core_type = #tpu.core_type<tc>, window_params = [{transform_indices = @transform_0, window_bounds = array<i64: 2, 128>}, {transform_indices = @transform_1, window_bounds = array<i64: 128, 128>}, {pipeline_mode = #tpu.pipeline_mode<synchronous>, transform_indices = @transform_2, window_bounds = array<i64: 1, 128>}, {transform_indices = @transform_3, window_bounds = array<i64: 2, 128>}]} {
    %c0_i32 = arith.constant 0 : i32
    %0 = arith.cmpi eq, %arg1, %c0_i32 : i32
    %1 = arith.extui %0 : i1 to i32
    %c0_i32_0 = arith.constant 0 : i32
    %2 = arith.cmpi ne, %1, %c0_i32_0 : i32
    scf.if %2 {
      %cst_10 = arith.constant 0.000000e+00 : f32
      %12 = vector.broadcast %cst_10 : f32 to vector<2x128xf32>
      %c0_11 = arith.constant 0 : index
      %c0_12 = arith.constant 0 : index
      %13 = vector.load %arg5[%c0_11, %c0_12] : memref<2x128xf32, #tpu.memory_space<vmem>>, vector<2x128xf32>
      tpu.vector_store %arg5[%c0_11, %c0_12], %12 {strides = array<i32>} : memref<2x128xf32, #tpu.memory_space<vmem>>, vector<2x128xf32>,
    } else {
    }
    %c0 = arith.constant 0 : index
    %c0_1 = arith.constant 0 : index
    %3 = vector.load %arg5[%c0, %c0_1] : memref<2x128xf32, #tpu.memory_space<vmem>>, vector<2x128xf32>
    %c0_2 = arith.constant 0 : index
    %c0_3 = arith.constant 0 : index
    %4 = vector.load %arg2[%c0_2, %c0_3] : memref<2x128xbf16, #tpu.memory_space<vmem>>, vector<2x128xbf16>
    %c0_4 = arith.constant 0 : index
    %c0_5 = arith.constant 0 : index
    %5 = vector.load %arg3[%c0_4, %c0_5] : memref<128x128xbf16, #tpu.memory_space<vmem>>, vector<128x128xbf16>
    %cst = arith.constant dense<0.000000e+00> : vector<2x128xf32>
    %6 = tpu.matmul %4, %5, %cst {dimension_numbers = #tpu.dot_dimension_numbers<[1], [0], [0], [1], [0, 0, 1, 1], [], []>} : vector<2x128xbf16>, vector<128x128xbf16>, vector<2x128xf32> -> vector<2x128xf32>
    %7 = arith.addf %3, %6 : vector<2x128xf32>
    %c0_6 = arith.constant 0 : index
    %c0_7 = arith.constant 0 : index
    %8 = vector.load %arg5[%c0_6, %c0_7] : memref<2x128xf32, #tpu.memory_space<vmem>>, vector<2x128xf32>
    tpu.vector_store %arg5[%c0_6, %c0_7], %7 {strides = array<i32>} : memref<2x128xf32, #tpu.memory_space<vmem>>, vector<2x128xf32>,
    %c0_i32_8 = arith.constant 0 : i32
    %9 = arith.cmpi eq, %arg1, %c0_i32_8 : i32
    %10 = arith.extui %9 : i1 to i32
    %c0_i32_9 = arith.constant 0 : i32
    %11 = arith.cmpi ne, %10, %c0_i32_9 : i32
    scf.if %11 {
      %c0_10 = arith.constant 0 : index
      %c0_11 = arith.constant 0 : index
      %12 = vector.load %arg5[%c0_10, %c0_11] : memref<2x128xf32, #tpu.memory_space<vmem>>, vector<2x128xf32>
      %c0_12 = arith.constant 0 : index
      %c0_13 = arith.constant 0 : index
      %13 = vector.load %arg4[%c0_12, %c0_13] : memref<1x128xf32, #tpu.memory_space<vmem>>, vector<1x128xf32>
      %14 = vector.broadcast %13 : vector<1x128xf32> to vector<2x128xf32>
      %15 = arith.addf %12, %14 : vector<2x128xf32>
      %16 = arith.negf %15 : vector<2x128xf32>
      %17 = math.exp %16 : vector<2x128xf32>
      %cst_14 = arith.constant 1.000000e+00 : f32
      %18 = vector.broadcast %cst_14 : f32 to vector<2x128xf32>
      %19 = arith.addf %18, %17 : vector<2x128xf32>
      %20 = arith.divf %18, %19 : vector<2x128xf32>
      %c0_15 = arith.constant 0 : index
      %c0_16 = arith.constant 0 : index
      %21 = vector.load %arg5[%c0_15, %c0_16] : memref<2x128xf32, #tpu.memory_space<vmem>>, vector<2x128xf32>
      tpu.vector_store %arg5[%c0_15, %c0_16], %20 {strides = array<i32>} : memref<2x128xf32, #tpu.memory_space<vmem>>, vector<2x128xf32>,
    } else {
    }
    return
  }
  func.func @transform_0(%arg0: i32, %arg1: i32) -> (i32, i32) {
    %c0_i32 = arith.constant 0 : i32
    return %arg0, %arg1 : i32, i32
  }
  func.func @transform_1(%arg0: i32, %arg1: i32) -> (i32, i32) {
    %c0_i32 = arith.constant 0 : i32
    %c0_i32_0 = arith.constant 0 : i32
    return %arg1, %c0_i32 : i32, i32
  }
  func.func @transform_2(%arg0: i32, %arg1: i32) -> (i32, i32) {
    %c0_i32 = arith.constant 0 : i32
    %c0_i32_0 = arith.constant 0 : i32
    %c0_i32_1 = arith.constant 0 : i32
    return %c0_i32, %c0_i32_0 : i32, i32
  }
  func.func @transform_3(%arg0: i32, %arg1: i32) -> (i32, i32) {
    %c0_i32 = arith.constant 0 : i32
    %c0_i32_0 = arith.constant 0 : i32
    return %arg0, %c0_i32 : i32, i32
  }
}

</mosaic_0001>

<bundles_post_ra>
// kernel: tpu_custom_call.1
= control target key start
LH: loop header
LB: loop body
LE: loop exit
PB: predicated region body
PF: predicated region fallthrough
CT: control target
= control target key end

     0   :  { %8 = vsyncpa [#allocation3], 0  ;;  %s346_s0 = inlined_call_operand.hbm [shape: bf16[2,128], index: 0, kind: input, shape index: {}]   ;;  %s347_s1 = inlined_call_operand.hbm [shape: bf16[128,128], index: 1, kind: input, shape index: {}]   ;;  %s348_s2 = inlined_call_operand.vmem [shape: f32[1,128], index: 2, kind: input, shape index: {}]   ;;  %s349_s3 = inlined_call_operand.hbm [shape: f32[2,128], index: 3, kind: output, shape index: {}]  }
   0x1   :  { %9 = vsyncpa [#allocation6], 0 }
   0x2   :  { %10 = vsyncpa [#allocation4], 0  ;;  %s16_s14 = sshll.u32 %s346_s0, 4  ;;  %s308_s15 = smov [#allocation2]   ;;  %s17_s14 = int_to_ptr.hbm [resolvable:$true] %s16_s14 }
   0x3   :  { %s18_s16 = sshll.u32 %s308_s15, 4  ;;  %s26_s19 = sshll.u32 %s347_s1, 4  ;;  %s19_s16 = int_to_ptr.vmem [resolvable:$true] %s18_s16  ;;  %s27_s19 = int_to_ptr.hbm [resolvable:$true] %s26_s19 }
   0x4   :  { %21 = dma.hbm_to_vmem [thread:$0]  %s17_s14, 16, %s19_s16, [#allocation3]  }
   0x5   :  { %s309_s20 = smov [#allocation5]   ;;  %s310_s22 = smov 64  }
   0x6   :  { %s28_s21 = sshll.u32 %s309_s20, 4  ;;  %s311_s23 = smov 4   ;;  %s29_s21 = int_to_ptr.vmem [resolvable:$true] %s28_s21 }
   0x7   :  { %34 = dma.hbm_to_vmem [thread:$0]  %s27_s19, 1024, %s29_s21, [#allocation6], %s310_s22, %s310_s22, %s311_s23  }
   0x8   :  { %302 = dma.done.wait [#allocation3], 16  }
   0x9   :  { %303 = vsyncadd [#allocation3], 4294967280 }
   0xa   :  { %304 = dma.done.wait [#allocation6], 1024  }
   0xb   :  { %305 = vsyncadd [#allocation6], 4294966272  ;;  %v218_v0 = vld [vmem:[#allocation5 + $0x38] sm:$0xff]  ;;  %v217_v1 = vld [vmem:[#allocation5 + $0x30] sm:$0xff]  ;;  %v312_v2 = vmov 0.0   ;;  %s313_s24 = smov [#allocation7]  }
   0xc   :  { %116 = vmatpush.bf16.msra.mxu0 %v218_v0  ;;  %49 = vst [vmem:[#allocation7] sm:$0x3] %v312_v2  ;;  %v216_v3 = vld [vmem:[#allocation5 + $0x28] sm:$0xff]  ;;  %v215_v4 = vld [vmem:[#allocation5 + $0x20] sm:$0xff]  ;;  %v214_v5 = vld [vmem:[#allocation5 + $0x18] sm:$0xff]  ;;  %s165_s25 = sshll.u32 %s313_s24, 4  ;;  %s166_s25 = int_to_ptr.vmem [resolvable:$true] %s165_s25 }
   0xd   :  { %v213_v6 = vld [vmem:[#allocation5 + $0x10] sm:$0xff]  ;;  %v212_v7 = vld [vmem:[#allocation5 + $0x8] sm:$0xff]  ;;  %v211_v8 = vld [vmem:[#allocation5] sm:$0xff] }
   0xe   :  { %v51_v9 = vld [vmem:[#allocation2] sm:$0x1] }
   0xf   :  { %v225_v13 = vld [vmem:[%s348_s2] ss:$0 sm:$0xff]  ;;  %s167_s2 = sshll.u32 %s349_s3, 4  ;;  %s168_s2 = int_to_ptr.hbm [resolvable:$true] %s167_s2 }
  0x10   :  { %117 = vmatpush.bf16.msra.mxu0 %v217_v1 }
  0x13   :  { %v50_v10 = vld [vmem:[#allocation7] sm:$0x3] }
  0x14   :  { %118 = vmatpush.bf16.msra.mxu0 %v216_v3 }
  0x18   :  { %119 = vmatpush.bf16.msra.mxu0 %v215_v4 }
  0x1c   :  { %120 = vmatpush.bf16.msra.mxu0 %v214_v5 }
  0x20   :  { %121 = vmatpush.bf16.msra.mxu0 %v213_v6 }
  0x24   :  { %122 = vmatpush.bf16.msra.mxu0 %v212_v7 }
  0x28   :  { %123 = vmatpush.bf16.msra.mxu0 %v211_v8 }
  0x2b   :  { %124 = vmatmul.bf16.vlgmr.msra.gmra.mxu0 %v51_v9 }
  0xa8   :  { %v125_v11 = vpop.f32.mrf.mxu0 }
  0xa9   :  { %v129_v12 = vadd.f32 %v125_v11, %v50_v10 }
  0xab   :  { %130 = vst [vmem:[#allocation7] sm:$0x3] %v129_v12 }
  0xb0   :  { %v127_v14 = vpop.f32.mrf.mxu0 }
  0xb2   :  { %v134_v15 = vld [vmem:[#allocation7] sm:$0x3] }
  0xb3   :  { %v139_v16 = vadd.f32 %v225_v13, %v134_v15 }
  0xb5   :  { %v210_v17 = vmul.f32 -1.442695, %v139_v16 }
  0xb7   :  { %226 = vpow2.f32 %v210_v17 }
  0xbd   :  { %v227_v18 = vpop.eup %226 }
  0xbe   :  { %v143_v19 = vadd.f32 1.0, %v227_v18 }
  0xc0   :  { %228 = vrcp.f32 %v143_v19  ;;  %v155_v23 = vand.u32 2147483648, %v143_v19  ;;  %v153_v25 = vand.u32 2147483647, %v143_v19  ;;  %vm149_vm1 = vweird.f32 %v143_v19 }
  0xc2   :  { %v156_v27 = vor.u32 1.1754944e-38, %v155_v23  ;;  %vm154_vm3 = vcmp.eq.f32.partialorder %v153_v25, 8.507059e+37 }
  0xc6   :  { %v229_v20 = vpop.eup %228 }
  0xc7   :  { %v145_v21 = vmul.f32 %v229_v20, %v143_v19  ;;  %vm150_vm0 = vweird.f32 %v229_v20 }
  0xc8   :  { %vm151_vm2 = vmor %vm149_vm1, %vm150_vm0 }
  0xc9   :  { %v146_v22 = vsub.f32 1.0, %v145_v21 }
  0xcb   :  { %v147_v24 = vmul.f32 %v229_v20, %v146_v22 }
  0xcd   :  { %v148_v26 = vadd.f32 %v229_v20, %v147_v24 }
  0xcf   :  { %v152_v28 = vsel %vm151_vm2, %v229_v20, %v148_v26 }
  0xd0   :  { %v157_v29 = vsel %vm154_vm3, %v156_v27, %v152_v28 }
  0xd1   :  { %159 = vst [vmem:[#allocation7] sm:$0x3] %v157_v29 }
  0xd2   :  { %170 = dma.vmem_to_hbm [thread:$0]  %s166_s25, 32, %s168_s2, [#allocation4]  }
  0xd3   :  { %306 = dma.done.wait [#allocation4], 32  }
  0xd4   :  { %307 = vsyncadd [#allocation4], 4294967264 }
  0xd5   :  { %175 = vsyncpa [#allocation3], 1 }
  0xd6   :  { %176 = vsyncpa [#allocation6], 1 }
  0xd7   :  { %177 = vsyncpa [#allocation4], 1 }

</bundles_post_ra>
